<compile_context>
chip_gen: v7x
topology: tpu7x:2x2x1
jax: 0.10.0
libtpu: 0.0.40
codegen_flags: <defaults>
</compile_context>

<pallas_src>
import jax
import jax.numpy as jnp
from jax.experimental import pallas as pl
from jax.experimental.pallas import tpu as pltpu

LANES = 128
MAX_TILE_ROWS = 1024  # 1024 x 128 x 4B = 512 KiB per input block


def _make_mrae_sum_kernel(tile_r, valid_rows, needs_mask):
    """Build the reduction kernel with static tile/mask parameters baked in."""

    def kernel(o_ref, l_ref, out_ref, acc_ref):
        i = pl.program_id(0)

        @pl.when(i == 0)
        def _init():
            acc_ref[...] = jnp.zeros_like(acc_ref)

        # Upcast in-kernel (no HBM copy in the wrapper).
        o = o_ref[...].astype(jnp.float32)
        l = l_ref[...].astype(jnp.float32)
        err = jnp.abs(o - l) / l

        if needs_mask:
            # Last grid step may read past the end of the array; zero out the
            # invalid rows (their contents are undefined).
            row = i * tile_r + jax.lax.broadcasted_iota(
                jnp.int32, (tile_r, LANES), 0
            )
            err = jnp.where(row < valid_rows, err, jnp.float32(0.0))

        # Pure VPU lane-wise accumulate; no cross-lane work per step.
        acc_ref[...] += err

        @pl.when(i == pl.num_programs(0) - 1)
        def _finalize():
            # Single XLU reduce at the end: sublanes first, then lanes.
            col = jnp.sum(acc_ref[...], axis=0, keepdims=True)      # (1, LANES)
            out_ref[...] = jnp.sum(col, axis=1, keepdims=True)      # (1, 1)

    return kernel


def mrae_loss(outputs, label):
    """Pallas implementation of Loss_train.forward (MRAE)."""
    assert outputs.shape == label.shape
    o = outputs.reshape(-1)
    l = label.reshape(-1)
    n = o.shape[0]

    # Pad only up to the next lane multiple (at most 127 elements) with neutral
    # values so padding contributes exactly 0 to the sum.  For the production
    # (2,4,16,16) shape this is a no-op (2048 % 128 == 0), so no HBM copy.
    lane_pad = (-n) % LANES
    if lane_pad:
        o = jnp.concatenate([o, jnp.ones((lane_pad,), o.dtype)])
        l = jnp.concatenate([l, jnp.ones((lane_pad,), l.dtype)])

    rows = o.shape[0] // LANES
    o2 = o.reshape(rows, LANES)
    l2 = l.reshape(rows, LANES)

    # Largest tile that fits the budget; small inputs -> one block, grid=(1,).
    tile_r = rows if rows <= MAX_TILE_ROWS else MAX_TILE_ROWS
    grid_n = pl.cdiv(rows, tile_r)
    needs_mask = (rows % tile_r) != 0

    kernel = _make_mrae_sum_kernel(tile_r, rows, needs_mask)

    total = pl.pallas_call(
        kernel,
        out_shape=jax.ShapeDtypeStruct((1, 1), jnp.float32),
        grid_spec=pltpu.PrefetchScalarGridSpec(
            num_scalar_prefetch=0,
            grid=(grid_n,),
            in_specs=[
                pl.BlockSpec((tile_r, LANES), lambda i: (i, 0)),
                pl.BlockSpec((tile_r, LANES), lambda i: (i, 0)),
            ],
            out_specs=pl.BlockSpec((1, 1), lambda i: (0, 0)),
            scratch_shapes=[pltpu.VMEM((tile_r, LANES), jnp.float32)],
        ),
        compiler_params=pltpu.CompilerParams(
            dimension_semantics=("arbitrary",),
        ),
    )(o2, l2)

    # Cheap scalar glue: divide by the true (unpadded) element count.
    return total[0, 0] / jnp.float32(n)


if __name__ == "__main__":
    key = jax.random.PRNGKey(0)
    k_out, k_lab = jax.random.split(key)

    # Small NCHW shapes consistent with the module's usage.
    outputs = jax.random.uniform(
        k_out, (2, 4, 16, 16), dtype=jnp.float32, minval=0.1, maxval=1.0
    )
    label = jax.random.uniform(
        k_lab, (2, 4, 16, 16), dtype=jnp.float32, minval=0.1, maxval=1.0
    )

    mrae = mrae_loss(outputs, label)
    jax.block_until_ready(mrae)

    # Pure-JAX reference check.
    ref = jnp.mean(jnp.abs(outputs - label) / label)
    assert jnp.allclose(mrae, ref, rtol=1e-5, atol=1e-6), (mrae, ref)

    print("KERNEL_OK")
</pallas_src>

<mosaic_0001>
module attributes {stable_mosaic.version = 11 : i64} {
  func.func @kernel(%arg0: i32, %arg1: memref<16x128xf32, #tpu.memory_space<vmem>>, %arg2: memref<16x128xf32, #tpu.memory_space<vmem>>, %arg3: memref<1x1xf32, #tpu.memory_space<vmem>>, %arg4: memref<16x128xf32, #tpu.memory_space<vmem>>) attributes {dimension_semantics = [#tpu.dimension_semantics<arbitrary>], iteration_bounds = array<i64: 1>, scalar_prefetch = 0 : i64, scratch_operands = 1 : i64, tpu.core_type = #tpu.core_type<tc>, window_params = [{transform_indices = @transform_0, window_bounds = array<i64: 16, 128>}, {transform_indices = @transform_1, window_bounds = array<i64: 16, 128>}, {pipeline_mode = #tpu.pipeline_mode<synchronous>, transform_indices = @transform_2, window_bounds = array<i64: 1, 1>}]} {
    %c0_i32 = arith.constant 0 : i32
    %0 = arith.cmpi eq, %arg0, %c0_i32 : i32
    %1 = arith.extui %0 : i1 to i32
    %c0_i32_0 = arith.constant 0 : i32
    %2 = arith.cmpi ne, %1, %c0_i32_0 : i32
    scf.if %2 {
      %cst = arith.constant 0.000000e+00 : f32
      %14 = vector.broadcast %cst : f32 to vector<16x128xf32>
      %c0_10 = arith.constant 0 : index
      %c0_11 = arith.constant 0 : index
      %15 = vector.load %arg4[%c0_10, %c0_11] : memref<16x128xf32, #tpu.memory_space<vmem>>, vector<16x128xf32>
      tpu.vector_store %arg4[%c0_10, %c0_11], %14 {strides = array<i32>} : memref<16x128xf32, #tpu.memory_space<vmem>>, vector<16x128xf32>,
    } else {
    }
    %c0 = arith.constant 0 : index
    %c0_1 = arith.constant 0 : index
    %3 = vector.load %arg1[%c0, %c0_1] : memref<16x128xf32, #tpu.memory_space<vmem>>, vector<16x128xf32>
    %c0_2 = arith.constant 0 : index
    %c0_3 = arith.constant 0 : index
    %4 = vector.load %arg2[%c0_2, %c0_3] : memref<16x128xf32, #tpu.memory_space<vmem>>, vector<16x128xf32>
    %5 = arith.subf %3, %4 : vector<16x128xf32>
    %6 = math.absf %5 : vector<16x128xf32>
    %7 = arith.divf %6, %4 : vector<16x128xf32>
    %c0_4 = arith.constant 0 : index
    %c0_5 = arith.constant 0 : index
    %8 = vector.load %arg4[%c0_4, %c0_5] : memref<16x128xf32, #tpu.memory_space<vmem>>, vector<16x128xf32>
    %9 = arith.addf %8, %7 : vector<16x128xf32>
    %c0_6 = arith.constant 0 : index
    %c0_7 = arith.constant 0 : index
    %10 = vector.load %arg4[%c0_6, %c0_7] : memref<16x128xf32, #tpu.memory_space<vmem>>, vector<16x128xf32>
    tpu.vector_store %arg4[%c0_6, %c0_7], %9 {strides = array<i32>} : memref<16x128xf32, #tpu.memory_space<vmem>>, vector<16x128xf32>,
    %c0_i32_8 = arith.constant 0 : i32
    %11 = arith.cmpi eq, %arg0, %c0_i32_8 : i32
    %12 = arith.extui %11 : i1 to i32
    %c0_i32_9 = arith.constant 0 : i32
    %13 = arith.cmpi ne, %12, %c0_i32_9 : i32
    scf.if %13 {
      %c0_10 = arith.constant 0 : index
      %c0_11 = arith.constant 0 : index
      %14 = vector.load %arg4[%c0_10, %c0_11] : memref<16x128xf32, #tpu.memory_space<vmem>>, vector<16x128xf32>
      %cst = arith.constant dense<0.000000e+00> : vector<128xf32>
      %15 = vector.multi_reduction <add>, %14, %cst [0] : vector<16x128xf32> to vector<128xf32>
      %16 = vector.shape_cast %15 : vector<128xf32> to vector<1x128xf32>
      %cst_12 = arith.constant dense<0.000000e+00> : vector<1xf32>
      %17 = vector.multi_reduction <add>, %16, %cst_12 [1] : vector<1x128xf32> to vector<1xf32>
      %18 = vector.shape_cast %17 : vector<1xf32> to vector<1x1xf32>
      %c0_13 = arith.constant 0 : index
      %c0_14 = arith.constant 0 : index
      %19 = vector.load %arg3[%c0_13, %c0_14] : memref<1x1xf32, #tpu.memory_space<vmem>>, vector<1x1xf32>
      tpu.vector_store %arg3[%c0_13, %c0_14], %18 {strides = array<i32>} : memref<1x1xf32, #tpu.memory_space<vmem>>, vector<1x1xf32>,
    } else {
    }
    return
  }
  func.func @transform_0(%arg0: i32) -> (i32, i32) {
    %c0_i32 = arith.constant 0 : i32
    %c0_i32_0 = arith.constant 0 : i32
    return %arg0, %c0_i32 : i32, i32
  }
  func.func @transform_1(%arg0: i32) -> (i32, i32) {
    %c0_i32 = arith.constant 0 : i32
    %c0_i32_0 = arith.constant 0 : i32
    return %arg0, %c0_i32 : i32, i32
  }
  func.func @transform_2(%arg0: i32) -> (i32, i32) {
    %c0_i32 = arith.constant 0 : i32
    %c0_i32_0 = arith.constant 0 : i32
    %c0_i32_1 = arith.constant 0 : i32
    return %c0_i32, %c0_i32_0 : i32, i32
  }
}

</mosaic_0001>

<bundles_post_ra>
// kernel: tpu_custom_call.1
= control target key start
LH: loop header
LB: loop body
LE: loop exit
PB: predicated region body
PF: predicated region fallthrough
CT: control target
= control target key end

     0   :  { %7 = vsyncpa [#allocation4], 0  ;;  %s233_s0 = inlined_call_operand.hbm [shape: f32[16,128], index: 0, kind: input, shape index: {}]   ;;  %s234_s1 = inlined_call_operand.hbm [shape: f32[16,128], index: 1, kind: input, shape index: {}]   ;;  %s235_s2 = inlined_call_operand.hbm [shape: f32[1,1], index: 2, kind: output, shape index: {}]  }
   0x1   :  { %8 = vsyncpa [#allocation7], 0 }
   0x2   :  { %9 = vsyncpa [#allocation5], 0  ;;  %s177_s9 = smov [#allocation3]   ;;  %s105_s13 = scalar_lea.hbm %s233_s0, 256 }
   0x3   :  { %s15_s10 = sshll.u32 %s177_s9, 4  ;;  %p106_p0 = scmp.ne.s32.totalorder %s233_s0, %s105_s13  ;;  %s16_s10 = int_to_ptr.vmem [resolvable:$true] %s15_s10 }
   0x4   :  { %p109_p1 = scmp.lt.u32.totalorder %s105_s13, %s233_s0 }
   0x6   :  { %p111_p2 = pnand %p109_p1, %p106_p0 }
   0x8   :  { %114 = shalt.err (!%p111_p2)
}
   0x9   :  { %s115_s18 = scalar_lea.vmem %s16_s10, 256  ;;  %p120_p4 = scmp.lt.s32.totalorder %s16_s10, %s16_s10 }
   0xa   :  { %p116_p3 = scmp.ne.s32.totalorder %s16_s10, %s115_s18  ;;  %p121_p5 = scmp.lt.s32.totalorder %s115_s18, %s115_s18 }
   0xc   :  { %p122_p6 = por %p121_p5, %p120_p4 }
   0xe   :  { %p123_p7 = pnand %p122_p6, %p116_p3 }
  0x10   :  { %126 = shalt.err (!%p123_p7)
}
  0x11   :  { %s178_s19 = smov 128   ;;  %s179_s20 = smov 8  }
  0x12   :  { %21 = dma.hbm_to_vmem [thread:$0]  %s233_s0, 256, %s16_s10, [#allocation4], %s178_s19, %s178_s19, %s179_s20  }
  0x13   :  { %s180_s23 = smov [#allocation6]   ;;  %s127_s27 = scalar_lea.hbm %s234_s1, 256 }
  0x14   :  { %s27_s24 = sshll.u32 %s180_s23, 4  ;;  %p128_p8 = scmp.ne.s32.totalorder %s234_s1, %s127_s27  ;;  %s28_s24 = int_to_ptr.vmem [resolvable:$true] %s27_s24 }
  0x15   :  { %p131_p9 = scmp.lt.u32.totalorder %s127_s27, %s234_s1 }
  0x17   :  { %p133_p10 = pnand %p131_p9, %p128_p8 }
  0x19   :  { %136 = shalt.err (!%p133_p10)
}
  0x1a   :  { %s137_s4 = scalar_lea.vmem %s28_s24, 256  ;;  %p142_p12 = scmp.lt.s32.totalorder %s28_s24, %s28_s24 }
  0x1b   :  { %p138_p11 = scmp.ne.s32.totalorder %s28_s24, %s137_s4  ;;  %p143_p13 = scmp.lt.s32.totalorder %s137_s4, %s137_s4 }
  0x1d   :  { %p144_p0 = por %p143_p13, %p142_p12 }
  0x1f   :  { %p145_p1 = pnand %p144_p0, %p138_p11 }
  0x21   :  { %148 = shalt.err (!%p145_p1)
}
  0x22   :  { %33 = dma.hbm_to_vmem [thread:$0]  %s234_s1, 256, %s28_s24, [#allocation7], %s178_s19, %s178_s19, %s179_s20  }
  0x23   :  { %171 = dma.done.wait [#allocation4], 256  }
  0x24   :  { %172 = vsyncadd [#allocation4], 4294967040 }
  0x25   :  { %173 = dma.done.wait [#allocation7], 256  }
  0x26   :  { %174 = vsyncadd [#allocation7], 4294967040  ;;  %v48_v0 = vld [vmem:[#allocation6] sm:$0xff]  ;;  %v46_v1 = vld [vmem:[#allocation3] sm:$0xff]  ;;  %s181_s1 = smov [#allocation8]   ;;  %vm78_vm0 = vcmask 0  }
  0x27   :  { %v49_v2 = vld [vmem:[#allocation6 + $0x8] sm:$0xff]  ;;  %101 = vrcp.f32 %v48_v0  ;;  %v47_v3 = vld [vmem:[#allocation3 + $0x8] sm:$0xff]  ;;  %v50_v4 = vsub.f32 %v46_v1, %v48_v0  ;;  %s86_s6 = sshll.u32 %s181_s1, 4  ;;  %s87_s6 = int_to_ptr.vmem [resolvable:$true] %s86_s6 }
  0x28   :  { %103 = vrcp.f32 %v49_v2  ;;  %v51_v5 = vsub.f32 %v47_v3, %v49_v2  ;;  %s149_s7 = scalar_lea.vmem %s87_s6, 16  ;;  %s153_s8 = scalar_lea.vmem %s87_s6, 32 }
  0x29   :  { %v52_v6 = vand.u32 2147483647, %v50_v4  ;;  %p150_p2 = scmp.ne.s32.totalorder %s87_s6, %s149_s7  ;;  %p154_p3 = scmp.lt.s32.totalorder %s87_s6, %s87_s6 }
  0x2a   :  { %v53_v7 = vand.u32 2147483647, %v51_v5  ;;  %p155_p4 = scmp.lt.s32.totalorder %s153_s8, %s149_s7 }
  0x2c   :  { %p156_p5 = por %p155_p4, %p154_p3 }
  0x2e   :  { %p157_p6 = pnand %p156_p5, %p150_p2 }
  0x31   :  { %v102_v8 = vpop.eup %101 }
  0x32   :  { %v104_v9 = vpop.eup %103  ;;  %v55_v10 = vmul.f32 %v102_v8, %v52_v6 }
  0x33   :  { %v57_v11 = vmul.f32 %v104_v9, %v53_v7 }
  0x35   :  { %v69_v12 = vadd.f32 %v57_v11, %v55_v10 }
  0x37   :  { %v70_v13 = vrot.slane %v69_v12, 4 }
  0x39   :  { %v71_v14 = vadd.f32 %v70_v13, %v69_v12 }
  0x3b   :  { %v72_v15 = vrot.slane %v71_v14, 2 }
  0x3d   :  { %v73_v16 = vadd.f32 %v72_v15, %v71_v14 }
  0x3f   :  { %v74_v17 = vrot.slane %v73_v16, 1 }
  0x41   :  { %v75_v18 = vadd.f32 %v74_v17, %v73_v16 }
  0x43   :  { %76 = vadd.xlane.f32.xlu0 %v75_v18 }
  0xd0   :  { %v77_v19 = vpop.xlane.xlu0 %76 }
  0xd1   :  { %79 = vst.msk [vmem:[#allocation8] sm:$0x1] %vm78_vm0, %v77_v19 }
  0xd2   :  { %160 = shalt.err (!%p157_p6)
}
  0xd3   :  { %s161_s11 = scalar_lea.hbm %s235_s2, 16 }
  0xd4   :  { %p162_p7 = scmp.ne.s32.totalorder %s235_s2, %s161_s11  ;;  %p165_p8 = scmp.lt.u32.totalorder %s161_s11, %s235_s2 }
  0xd6   :  { %p167_p9 = pnand %p165_p8, %p162_p7 }
  0xd8   :  { %170 = shalt.err (!%p167_p9)
}
  0xd9   :  { %89 = dma.vmem_to_hbm [thread:$0]  %s87_s6, 16, %s235_s2, [#allocation5]  }
  0xda   :  { %175 = dma.done.wait [#allocation5], 16  }
  0xdb   :  { %176 = vsyncadd [#allocation5], 4294967280 }
  0xdc   :  { %93 = vsyncpa [#allocation4], 1 }
  0xdd   :  { %94 = vsyncpa [#allocation7], 1 }
  0xde   :  { %95 = vsyncpa [#allocation5], 1 }

</bundles_post_ra>
